<compile_context>
chip_gen: v7x
topology: tpu7x:2x2x1
jax: 0.10.0
libtpu: 0.0.40
codegen_flags: <defaults>
</compile_context>

<pallas_src>
import functools

import jax
import jax.numpy as jnp
from jax.experimental import pallas as pl
from jax.experimental.pallas import tpu as pltpu


def _round_up(v, m):
    return ((v + m - 1) // m) * m


# ---------------------------------------------------------------------------
# Kernel: fused conv gates + peephole LSTM update + max-pool (grid over batch)
# ---------------------------------------------------------------------------
def _convlstm_fused_kernel(x_ref, h_ref, c_ref, w_ref, b_ref,
                           wci_ref, wcf_ref, wco_ref,
                           ch_ref, cc_ref, pool_ref, mpool_ref,
                           *, L, K, Cin, Chq, Bt, kp, sp, pp, Lpool):
    # ---- one fused im2col matmul for all 4 gates, hidden + input paths -----
    #   slab[:, t*Chq + ci]         = h_pad[l + t, ci]     (t < K)
    #   slab[:, K*Chq + t*Cin + ci] = x_pad[l + t, ci]
    taps = ([h_ref[:, t:t + L, :] for t in range(K)] +
            [x_ref[:, t:t + L, :] for t in range(K)])
    a = jnp.concatenate(taps, axis=-1).reshape(Bt * L, K * (Chq + Cin))
    z = jnp.dot(a, w_ref[...], preferred_element_type=jnp.float32)
    z = (z + b_ref[...]).reshape(Bt, L, 4 * Chq)   # bias only on the Wx convs

    # ---- peephole LSTM gate math (f32) --------------------------------------
    c = c_ref[...]
    zi = z[..., 0 * Chq:1 * Chq]
    zf = z[..., 1 * Chq:2 * Chq]
    zg = z[..., 2 * Chq:3 * Chq]
    zo = z[..., 3 * Chq:4 * Chq]
    ci = jax.nn.sigmoid(zi + c * wci_ref[...])
    cf = jax.nn.sigmoid(zf + c * wcf_ref[...])
    cc = cf * c + ci * jnp.tanh(zg)
    co = jax.nn.sigmoid(zo + cc * wco_ref[...])
    ch = co * jnp.tanh(cc)
    cc_ref[...] = cc                        # f32 state carry
    ch_ref[...] = ch.astype(ch_ref.dtype)   # bf16 output (halves HBM writeback)

    # ---- MaxPool1d over L ----------------------------------------------------
    # Stage ch (plus an optional -inf halo) in a VMEM scratch, then take kp
    # strided sublane reads and a running maximum.  No selection matmul, no
    # per-batch loop; padded hidden lanes stay exactly 0 and never mix with
    # real channels (pooling only mixes along L).
    if pp > 0:
        neg = jnp.full((Bt, pp, Chq), -jnp.inf, jnp.float32)
        mpool_ref[:, 0:pp, :] = neg
        mpool_ref[:, pp + L:pp + L + pp, :] = neg
    mpool_ref[:, pp:pp + L, :] = ch
    m = mpool_ref[:, pl.ds(0, Lpool, stride=sp), :]
    for w in range(1, kp):
        m = jnp.maximum(m, mpool_ref[:, pl.ds(w, Lpool, stride=sp), :])
    pool_ref[...] = m


# ---------------------------------------------------------------------------
# One-time (per model) weight prep: flatten / pad / cast — hoisted out of the
# per-step wrapper so it is not re-materialized ahead of every kernel launch.
# ---------------------------------------------------------------------------
def prepare_convlstm_params(params, *, kernel_size, compute_dtype=jnp.bfloat16):
    """params:
      wx : (4, K, Cin, Ch)  input->hidden conv weights, gate order (i, f, c, o)
      wh : (4, K, Ch,  Ch)  hidden->hidden conv weights (bias=False)
      bx : (4, Ch)          input-conv biases
      wci/wcf/wco : (L, Ch) peephole weights
      gamma/beta : (Ch,)    BatchNorm1d affine parameters
    """
    K = kernel_size
    _, K_, Cin, Ch = params["wx"].shape
    assert K_ == K
    Chq = _round_up(Ch, 32)            # 4*Chq is a multiple of 128 lanes
    pc = Chq - Ch
    # wh[g, t, ci, co] -> w_all[t*Chq + ci, g*Chq + co]
    wh = jnp.pad(params["wh"], ((0, 0), (0, 0), (0, pc), (0, pc)))
    wh_rows = jnp.transpose(wh, (1, 2, 0, 3)).reshape(K * Chq, 4 * Chq)
    # wx[g, t, ci, co] -> w_all[K*Chq + t*Cin + ci, g*Chq + co]
    wx = jnp.pad(params["wx"], ((0, 0), (0, 0), (0, 0), (0, pc)))
    wx_rows = jnp.transpose(wx, (1, 2, 0, 3)).reshape(K * Cin, 4 * Chq)
    w_all = jnp.concatenate([wh_rows, wx_rows], axis=0).astype(compute_dtype)
    b_row = jnp.pad(params["bx"], ((0, 0), (0, pc))).reshape(1, 4 * Chq)
    return dict(
        w_all=w_all,
        b_row=b_row.astype(jnp.float32),
        wci=jnp.pad(params["wci"], ((0, 0), (0, pc))).astype(jnp.float32),
        wcf=jnp.pad(params["wcf"], ((0, 0), (0, pc))).astype(jnp.float32),
        wco=jnp.pad(params["wco"], ((0, 0), (0, pc))).astype(jnp.float32),
        gamma=params["gamma"], beta=params["beta"],
        Cin=Cin, Ch=Ch, Chq=Chq, K=K,
    )


def _auto_batch_tile(B, L, Lp, Chq, Cin, K, kp, sp, pp,
                     budget_bytes=20 * 2**20):
    """Largest divisor of B whose per-step VMEM footprint fits the budget."""
    Lpool = (L + 2 * pp - kp) // sp + 1

    def est(bt):
        ins = 2 * bt * (Lp * (Chq + Cin) * 2 + L * Chq * 4)       # x,h bf16 + c f32
        outs = 2 * bt * (L * Chq * (2 + 4) + Lpool * Chq * 4)     # ch bf16, cc/pool f32
        live = bt * L * (K * (Chq + Cin) * 2 + 6 * 4 * Chq)       # slab + gate temps
        scratch = bt * (L + 2 * pp) * Chq * 4
        return ins + outs + live + scratch

    best = 1
    for bt in range(2, B + 1):
        if B % bt == 0 and est(bt) <= budget_bytes:
            best = bt
    return best


# ---------------------------------------------------------------------------
# Wrapper (PyTorch NCL in / NCL out)
# ---------------------------------------------------------------------------
def conv_lstm_cell(x, h, c, prepped, *, padding,
                   kernel_size_pool, stride_pool, padding_pool,
                   bn_eps=1e-5, batch_tile=None, compute_dtype=jnp.bfloat16):
    B, Cin, L = x.shape
    Ch, Chq, K = prepped["Ch"], prepped["Chq"], prepped["K"]
    assert h.shape == (B, Ch, L) and c.shape == (B, Ch, L)
    assert Cin == prepped["Cin"]
    pad = padding
    kp, sp, pp = kernel_size_pool, stride_pool, padding_pool
    assert 2 * pad == K - 1, "peephole term c*Wci needs 'same' conv length"
    assert 2 * pp <= kp, "MaxPool1d requires padding <= kernel_size // 2"
    Lp = L + 2 * pad
    Lpool = (L + 2 * pp - kp) // sp + 1

    if batch_tile is None:
        # Largest batch tile that fits VMEM -> Bt*L rows fill the MXU and
        # amortize per-grid-step overhead.  On v7x pass batch_tile=B//2 (even
        # grid) so dimension_semantics=("parallel",) spans both TensorCores.
        batch_tile = _auto_batch_tile(B, L, Lp, Chq, Cin, K, kp, sp, pp)
    Bt = batch_tile
    assert B % Bt == 0

    # NCL -> channels-last; conv halo + hidden-channel padding (to Chq).
    # TODO(synk): for the full recurrence, fuse the T steps into one
    # pallas_call with a time grid axis ("arbitrary") and keep h/c
    # channels-last + VMEM-resident across steps, dropping T-1 launches and
    # the per-step transpose/pad round-trips.
    x_cl = jnp.pad(jnp.transpose(x, (0, 2, 1)),
                   ((0, 0), (pad, pad), (0, 0))).astype(compute_dtype)
    h_cl = jnp.pad(jnp.transpose(h, (0, 2, 1)),
                   ((0, 0), (pad, pad), (0, Chq - Ch))).astype(compute_dtype)
    c_cl = jnp.pad(jnp.transpose(c, (0, 2, 1)),
                   ((0, 0), (0, 0), (0, Chq - Ch))).astype(jnp.float32)

    kern = functools.partial(_convlstm_fused_kernel,
                             L=L, K=K, Cin=Cin, Chq=Chq, Bt=Bt,
                             kp=kp, sp=sp, pp=pp, Lpool=Lpool)

    # Weight / bias / peephole specs use constant index_maps so they stay
    # VMEM-resident across grid steps (pipeline_mode=pl.Buffered(1) would also
    # drop their second pipeline buffer; left at default — they are tiny at
    # these channel counts).
    ch_cl, cc_cl, pool_cl = pl.pallas_call(
        kern,
        out_shape=(jax.ShapeDtypeStruct((B, L, Chq), compute_dtype),
                   jax.ShapeDtypeStruct((B, L, Chq), jnp.float32),
                   jax.ShapeDtypeStruct((B, Lpool, Chq), jnp.float32)),
        grid_spec=pltpu.PrefetchScalarGridSpec(
            num_scalar_prefetch=0,
            grid=(B // Bt,),
            in_specs=[
                pl.BlockSpec((Bt, Lp, Cin), lambda b: (b, 0, 0)),
                pl.BlockSpec((Bt, Lp, Chq), lambda b: (b, 0, 0)),
                pl.BlockSpec((Bt, L, Chq), lambda b: (b, 0, 0)),
                pl.BlockSpec((K * (Chq + Cin), 4 * Chq), lambda b: (0, 0)),
                pl.BlockSpec((1, 4 * Chq), lambda b: (0, 0)),
                pl.BlockSpec((L, Chq), lambda b: (0, 0)),
                pl.BlockSpec((L, Chq), lambda b: (0, 0)),
                pl.BlockSpec((L, Chq), lambda b: (0, 0)),
            ],
            out_specs=(
                pl.BlockSpec((Bt, L, Chq), lambda b: (b, 0, 0)),
                pl.BlockSpec((Bt, L, Chq), lambda b: (b, 0, 0)),
                pl.BlockSpec((Bt, Lpool, Chq), lambda b: (b, 0, 0)),
            ),
            scratch_shapes=[pltpu.VMEM((Bt, L + 2 * pp, Chq), jnp.float32)],
        ),
        compiler_params=pltpu.CompilerParams(
            dimension_semantics=("parallel",),
            vmem_limit_bytes=32 * 1024 * 1024),
    )(x_cl, h_cl, c_cl, prepped["w_all"], prepped["b_row"],
      prepped["wci"], prepped["wcf"], prepped["wco"])

    # BatchNorm1d (training-mode batch statistics) in plain JAX on the pooled
    # kernel output — memory-bound elementwise, XLA fuses it.
    # TODO(synk): nn.BatchNorm1d running_mean / running_var tracking is a
    # training-time side effect and is not reproduced; nn.Dropout is declared
    # in the module but unused in forward, so it is omitted.
    pool = pool_cl[..., :Ch]                                   # (B, Lpool, Ch)
    mean = jnp.mean(pool, axis=(0, 1), keepdims=True)
    var = jnp.mean((pool - mean) ** 2, axis=(0, 1), keepdims=True)  # biased
    pool_bn = (prepped["gamma"] * (pool - mean) * jax.lax.rsqrt(var + bn_eps)
               + prepped["beta"])

    # channels-last -> NCL to match the PyTorch return convention.
    ch_pool = jnp.transpose(pool_bn, (0, 2, 1))                # (B, Ch, Lpool)
    ch = jnp.transpose(ch_cl[..., :Ch], (0, 2, 1))             # (B, Ch, L) bf16
    cc = jnp.transpose(cc_cl[..., :Ch], (0, 2, 1))             # (B, Ch, L) f32
    return ch_pool, ch, cc


# ---------------------------------------------------------------------------
# Pure-JAX reference (mirrors the PyTorch forward, NCL layout)
# ---------------------------------------------------------------------------
def reference(x, h, c, params, *, K, pad, kp, sp, pp, eps=1e-5,
              conv_dtype=jnp.bfloat16):
    def conv(inp, w_tio, bias=None):
        w = jnp.transpose(w_tio, (2, 1, 0)).astype(conv_dtype)   # (Co,Ci,K)
        y = jax.lax.conv_general_dilated(
            inp.astype(conv_dtype), w, (1,), [(pad, pad)],
            dimension_numbers=("NCH", "OIH", "NCH"),
            preferred_element_type=jnp.float32)
        if bias is not None:
            y = y + bias[None, :, None]
        return y

    wci = jnp.transpose(params["wci"])[None]      # (1, Ch, L)
    wcf = jnp.transpose(params["wcf"])[None]
    wco = jnp.transpose(params["wco"])[None]

    ci = jax.nn.sigmoid(conv(x, params["wx"][0], params["bx"][0])
                        + conv(h, params["wh"][0]) + c * wci)
    cf = jax.nn.sigmoid(conv(x, params["wx"][1], params["bx"][1])
                        + conv(h, params["wh"][1]) + c * wcf)
    cc = cf * c + ci * jnp.tanh(conv(x, params["wx"][2], params["bx"][2])
                                + conv(h, params["wh"][2]))
    co = jax.nn.sigmoid(conv(x, params["wx"][3], params["bx"][3])
                        + conv(h, params["wh"][3]) + cc * wco)
    ch = co * jnp.tanh(cc)

    pooled = jax.lax.reduce_window(
        ch, -jnp.inf, jax.lax.max, (1, 1, kp), (1, 1, sp),
        [(0, 0), (0, 0), (pp, pp)])
    mean = jnp.mean(pooled, axis=(0, 2), keepdims=True)
    var = jnp.mean((pooled - mean) ** 2, axis=(0, 2), keepdims=True)
    gamma = params["gamma"][None, :, None]
    beta = params["beta"][None, :, None]
    ch_pool = gamma * (pooled - mean) * jax.lax.rsqrt(var + eps) + beta
    return ch_pool, ch, cc


if __name__ == "__main__":
    B, Cin, Ch, L = 2, 4, 32, 16
    K, pad = 3, 1
    kp, sp, pp = 2, 2, 0

    key = jax.random.PRNGKey(0)
    keys = jax.random.split(key, 9)
    scale = 0.1
    x = jax.random.normal(keys[0], (B, Cin, L), jnp.float32)
    h = jax.random.normal(keys[1], (B, Ch, L), jnp.float32)
    c = jax.random.normal(keys[2], (B, Ch, L), jnp.float32)

    # wx[g]: Conv1d(input->hidden) weights (K, Cin, Ch); wh[g]: (K, Ch, Ch).
    # Gate order g = 0:i, 1:f, 2:c, 3:o.  Peephole weights stored (L, Ch).
    params = dict(
        wx=jax.random.normal(keys[3], (4, K, Cin, Ch), jnp.float32) * scale,
        wh=jax.random.normal(keys[4], (4, K, Ch, Ch), jnp.float32) * scale,
        bx=jax.random.normal(keys[5], (4, Ch), jnp.float32) * scale,
        wci=jax.random.normal(keys[6], (L, Ch), jnp.float32) * scale,
        wcf=jax.random.normal(keys[7], (L, Ch), jnp.float32) * scale,
        wco=jax.random.normal(keys[8], (L, Ch), jnp.float32) * scale,
        gamma=jnp.ones((Ch,), jnp.float32),
        beta=jnp.zeros((Ch,), jnp.float32),
    )

    prepped = prepare_convlstm_params(params, kernel_size=K)   # hoisted once
    ch_pool, ch, cc = conv_lstm_cell(
        x, h, c, prepped, padding=pad,
        kernel_size_pool=kp, stride_pool=sp, padding_pool=pp)
    jax.block_until_ready((ch_pool, ch, cc))

    ref_pool, ref_ch, ref_cc = reference(
        x, h, c, params, K=K, pad=pad, kp=kp, sp=sp, pp=pp)

    # ch is emitted in bf16 (review: halve writeback); cc / pool stay f32.
    # Tolerances cover bf16 rounding of conv inputs / the stored ch; real
    # indexing or gate-order bugs produce errors orders of magnitude larger.
    err_ch = float(jnp.max(jnp.abs(ch.astype(jnp.float32) - ref_ch)))
    err_cc = float(jnp.max(jnp.abs(cc - ref_cc)))
    err_pool = float(jnp.max(jnp.abs(ch_pool - ref_pool)))
    assert err_ch < 2e-2, err_ch
    assert err_cc < 1e-2, err_cc
    assert err_pool < 2e-2, err_pool

    print("KERNEL_OK")
</pallas_src>

<mosaic_0001>
module attributes {stable_mosaic.version = 11 : i64} {
  func.func @_convlstm_fused_kernel(%arg0: i32, %arg1: memref<2x18x4xbf16, #tpu.memory_space<vmem>>, %arg2: memref<2x18x32xbf16, #tpu.memory_space<vmem>>, %arg3: memref<2x16x32xf32, #tpu.memory_space<vmem>>, %arg4: memref<108x128xbf16, #tpu.memory_space<vmem>>, %arg5: memref<1x128xf32, #tpu.memory_space<vmem>>, %arg6: memref<16x32xf32, #tpu.memory_space<vmem>>, %arg7: memref<16x32xf32, #tpu.memory_space<vmem>>, %arg8: memref<16x32xf32, #tpu.memory_space<vmem>>, %arg9: memref<2x16x32xbf16, #tpu.memory_space<vmem>>, %arg10: memref<2x16x32xf32, #tpu.memory_space<vmem>>, %arg11: memref<2x8x32xf32, #tpu.memory_space<vmem>>, %arg12: memref<2x16x32xf32, #tpu.memory_space<vmem>>) attributes {dimension_semantics = [#tpu.dimension_semantics<parallel>], iteration_bounds = array<i64: 1>, scalar_prefetch = 0 : i64, scratch_operands = 1 : i64, tpu.core_type = #tpu.core_type<tc>, window_params = [{transform_indices = @transform_0, window_bounds = array<i64: 2, 18, 4>}, {transform_indices = @transform_1, window_bounds = array<i64: 2, 18, 32>}, {transform_indices = @transform_2, window_bounds = array<i64: 2, 16, 32>}, {pipeline_mode = #tpu.pipeline_mode<synchronous>, transform_indices = @transform_3, window_bounds = array<i64: 108, 128>}, {pipeline_mode = #tpu.pipeline_mode<synchronous>, transform_indices = @transform_4, window_bounds = array<i64: 1, 128>}, {pipeline_mode = #tpu.pipeline_mode<synchronous>, transform_indices = @transform_5, window_bounds = array<i64: 16, 32>}, {pipeline_mode = #tpu.pipeline_mode<synchronous>, transform_indices = @transform_6, window_bounds = array<i64: 16, 32>}, {pipeline_mode = #tpu.pipeline_mode<synchronous>, transform_indices = @transform_7, window_bounds = array<i64: 16, 32>}, {transform_indices = @transform_8, window_bounds = array<i64: 2, 16, 32>}, {transform_indices = @transform_9, window_bounds = array<i64: 2, 16, 32>}, {transform_indices = @transform_10, window_bounds = array<i64: 2, 8, 32>}]} {
    %c0 = arith.constant 0 : index
    %c0_0 = arith.constant 0 : index
    %c0_1 = arith.constant 0 : index
    %0 = vector.load %arg2[%c0, %c0_0, %c0_1] : memref<2x18x32xbf16, #tpu.memory_space<vmem>>, vector<2x16x32xbf16>
    %c0_2 = arith.constant 0 : index
    %c1 = arith.constant 1 : index
    %c0_3 = arith.constant 0 : index
    %1 = vector.load %arg2[%c0_2, %c1, %c0_3] : memref<2x18x32xbf16, #tpu.memory_space<vmem>>, vector<2x16x32xbf16>
    %c0_4 = arith.constant 0 : index
    %c2 = arith.constant 2 : index
    %c0_5 = arith.constant 0 : index
    %2 = vector.load %arg2[%c0_4, %c2, %c0_5] : memref<2x18x32xbf16, #tpu.memory_space<vmem>>, vector<2x16x32xbf16>
    %c0_6 = arith.constant 0 : index
    %c0_7 = arith.constant 0 : index
    %c0_8 = arith.constant 0 : index
    %3 = vector.load %arg1[%c0_6, %c0_7, %c0_8] : memref<2x18x4xbf16, #tpu.memory_space<vmem>>, vector<2x16x4xbf16>
    %c0_9 = arith.constant 0 : index
    %c1_10 = arith.constant 1 : index
    %c0_11 = arith.constant 0 : index
    %4 = vector.load %arg1[%c0_9, %c1_10, %c0_11] : memref<2x18x4xbf16, #tpu.memory_space<vmem>>, vector<2x16x4xbf16>
    %c0_12 = arith.constant 0 : index
    %c2_13 = arith.constant 2 : index
    %c0_14 = arith.constant 0 : index
    %5 = vector.load %arg1[%c0_12, %c2_13, %c0_14] : memref<2x18x4xbf16, #tpu.memory_space<vmem>>, vector<2x16x4xbf16>
    %6 = tpu.concatenate %0, %1, %2, %3, %4, %5 in 2 : vector<2x16x32xbf16>, vector<2x16x32xbf16>, vector<2x16x32xbf16>, vector<2x16x4xbf16>, vector<2x16x4xbf16>, vector<2x16x4xbf16> -> vector<2x16x108xbf16>
    %7 = vector.shape_cast %6 : vector<2x16x108xbf16> to vector<32x108xbf16>
    %c0_15 = arith.constant 0 : index
    %c0_16 = arith.constant 0 : index
    %8 = vector.load %arg4[%c0_15, %c0_16] : memref<108x128xbf16, #tpu.memory_space<vmem>>, vector<108x128xbf16>
    %cst = arith.constant dense<0.000000e+00> : vector<32x128xf32>
    %9 = tpu.matmul %7, %8, %cst {dimension_numbers = #tpu.dot_dimension_numbers<[1], [0], [0], [1], [0, 0, 1, 1], [], []>} : vector<32x108xbf16>, vector<108x128xbf16>, vector<32x128xf32> -> vector<32x128xf32>
    %c0_17 = arith.constant 0 : index
    %c0_18 = arith.constant 0 : index
    %10 = vector.load %arg5[%c0_17, %c0_18] : memref<1x128xf32, #tpu.memory_space<vmem>>, vector<1x128xf32>
    %11 = vector.broadcast %10 : vector<1x128xf32> to vector<32x128xf32>
    %12 = arith.addf %9, %11 : vector<32x128xf32>
    %13 = vector.shape_cast %12 : vector<32x128xf32> to vector<2x16x128xf32>
    %c0_19 = arith.constant 0 : index
    %c0_20 = arith.constant 0 : index
    %c0_21 = arith.constant 0 : index
    %14 = vector.load %arg3[%c0_19, %c0_20, %c0_21] : memref<2x16x32xf32, #tpu.memory_space<vmem>>, vector<2x16x32xf32>
    %15 = vector.extract_strided_slice %13 {offsets = [0, 0, 0], sizes = [2, 16, 32], strides = [1, 1, 1]} : vector<2x16x128xf32> to vector<2x16x32xf32>
    %16 = vector.extract_strided_slice %13 {offsets = [0, 0, 32], sizes = [2, 16, 32], strides = [1, 1, 1]} : vector<2x16x128xf32> to vector<2x16x32xf32>
    %17 = vector.extract_strided_slice %13 {offsets = [0, 0, 64], sizes = [2, 16, 32], strides = [1, 1, 1]} : vector<2x16x128xf32> to vector<2x16x32xf32>
    %18 = vector.extract_strided_slice %13 {offsets = [0, 0, 96], sizes = [2, 16, 32], strides = [1, 1, 1]} : vector<2x16x128xf32> to vector<2x16x32xf32>
    %c0_22 = arith.constant 0 : index
    %c0_23 = arith.constant 0 : index
    %19 = vector.load %arg6[%c0_22, %c0_23] : memref<16x32xf32, #tpu.memory_space<vmem>>, vector<16x32xf32>
    %20 = vector.shape_cast %19 : vector<16x32xf32> to vector<1x16x32xf32>
    %21 = vector.broadcast %20 : vector<1x16x32xf32> to vector<2x16x32xf32>
    %22 = arith.mulf %14, %21 : vector<2x16x32xf32>
    %23 = arith.addf %15, %22 : vector<2x16x32xf32>
    %24 = arith.negf %23 : vector<2x16x32xf32>
    %25 = math.exp %24 : vector<2x16x32xf32>
    %cst_24 = arith.constant 1.000000e+00 : f32
    %26 = vector.broadcast %cst_24 : f32 to vector<2x16x32xf32>
    %27 = arith.addf %26, %25 : vector<2x16x32xf32>
    %28 = arith.divf %26, %27 : vector<2x16x32xf32>
    %c0_25 = arith.constant 0 : index
    %c0_26 = arith.constant 0 : index
    %29 = vector.load %arg7[%c0_25, %c0_26] : memref<16x32xf32, #tpu.memory_space<vmem>>, vector<16x32xf32>
    %30 = vector.shape_cast %29 : vector<16x32xf32> to vector<1x16x32xf32>
    %31 = vector.broadcast %30 : vector<1x16x32xf32> to vector<2x16x32xf32>
    %32 = arith.mulf %14, %31 : vector<2x16x32xf32>
    %33 = arith.addf %16, %32 : vector<2x16x32xf32>
    %34 = arith.negf %33 : vector<2x16x32xf32>
    %35 = math.exp %34 : vector<2x16x32xf32>
    %cst_27 = arith.constant 1.000000e+00 : f32
    %36 = vector.broadcast %cst_27 : f32 to vector<2x16x32xf32>
    %37 = arith.addf %36, %35 : vector<2x16x32xf32>
    %38 = arith.divf %36, %37 : vector<2x16x32xf32>
    %39 = arith.mulf %38, %14 : vector<2x16x32xf32>
    %40 = math.tanh %17 : vector<2x16x32xf32>
    %41 = arith.mulf %28, %40 : vector<2x16x32xf32>
    %42 = arith.addf %39, %41 : vector<2x16x32xf32>
    %c0_28 = arith.constant 0 : index
    %c0_29 = arith.constant 0 : index
    %43 = vector.load %arg8[%c0_28, %c0_29] : memref<16x32xf32, #tpu.memory_space<vmem>>, vector<16x32xf32>
    %44 = vector.shape_cast %43 : vector<16x32xf32> to vector<1x16x32xf32>
    %45 = vector.broadcast %44 : vector<1x16x32xf32> to vector<2x16x32xf32>
    %46 = arith.mulf %42, %45 : vector<2x16x32xf32>
    %47 = arith.addf %18, %46 : vector<2x16x32xf32>
    %48 = arith.negf %47 : vector<2x16x32xf32>
    %49 = math.exp %48 : vector<2x16x32xf32>
    %cst_30 = arith.constant 1.000000e+00 : f32
    %50 = vector.broadcast %cst_30 : f32 to vector<2x16x32xf32>
    %51 = arith.addf %50, %49 : vector<2x16x32xf32>
    %52 = arith.divf %50, %51 : vector<2x16x32xf32>
    %53 = math.tanh %42 : vector<2x16x32xf32>
    %54 = arith.mulf %52, %53 : vector<2x16x32xf32>
    %c0_31 = arith.constant 0 : index
    %c0_32 = arith.constant 0 : index
    %c0_33 = arith.constant 0 : index
    %55 = vector.load %arg10[%c0_31, %c0_32, %c0_33] : memref<2x16x32xf32, #tpu.memory_space<vmem>>, vector<2x16x32xf32>
    tpu.vector_store %arg10[%c0_31, %c0_32, %c0_33], %42 {strides = array<i32>} : memref<2x16x32xf32, #tpu.memory_space<vmem>>, vector<2x16x32xf32>,
    %56 = arith.truncf %54 : vector<2x16x32xf32> to vector<2x16x32xbf16>
    %c0_34 = arith.constant 0 : index
    %c0_35 = arith.constant 0 : index
    %c0_36 = arith.constant 0 : index
    %57 = vector.load %arg9[%c0_34, %c0_35, %c0_36] : memref<2x16x32xbf16, #tpu.memory_space<vmem>>, vector<2x16x32xbf16>
    tpu.vector_store %arg9[%c0_34, %c0_35, %c0_36], %56 {strides = array<i32>} : memref<2x16x32xbf16, #tpu.memory_space<vmem>>, vector<2x16x32xbf16>,
    %c0_37 = arith.constant 0 : index
    %c0_38 = arith.constant 0 : index
    %c0_39 = arith.constant 0 : index
    %58 = vector.load %arg12[%c0_37, %c0_38, %c0_39] : memref<2x16x32xf32, #tpu.memory_space<vmem>>, vector<2x16x32xf32>
    tpu.vector_store %arg12[%c0_37, %c0_38, %c0_39], %54 {strides = array<i32>} : memref<2x16x32xf32, #tpu.memory_space<vmem>>, vector<2x16x32xf32>,
    %c0_40 = arith.constant 0 : index
    %c0_41 = arith.constant 0 : index
    %c0_42 = arith.constant 0 : index
    %59 = tpu.strided_load %arg12[%c0_40, %c0_41, %c0_42] {strides = array<i32: 1, 2, 1>} : memref<2x16x32xf32, #tpu.memory_space<vmem>>, vector<2x8x32xf32>
    %c0_43 = arith.constant 0 : index
    %c1_44 = arith.constant 1 : index
    %c0_45 = arith.constant 0 : index
    %60 = tpu.strided_load %arg12[%c0_43, %c1_44, %c0_45] {strides = array<i32: 1, 2, 1>} : memref<2x16x32xf32, #tpu.memory_space<vmem>>, vector<2x8x32xf32>
    %61 = arith.maximumf %59, %60 : vector<2x8x32xf32>
    %c0_46 = arith.constant 0 : index
    %c0_47 = arith.constant 0 : index
    %c0_48 = arith.constant 0 : index
    %62 = vector.load %arg11[%c0_46, %c0_47, %c0_48] : memref<2x8x32xf32, #tpu.memory_space<vmem>>, vector<2x8x32xf32>
    tpu.vector_store %arg11[%c0_46, %c0_47, %c0_48], %61 {strides = array<i32>} : memref<2x8x32xf32, #tpu.memory_space<vmem>>, vector<2x8x32xf32>,
    return
  }
  func.func @transform_0(%arg0: i32) -> (i32, i32, i32) {
    %c0_i32 = arith.constant 0 : i32
    %c0_i32_0 = arith.constant 0 : i32
    %c0_i32_1 = arith.constant 0 : i32
    return %arg0, %c0_i32, %c0_i32_0 : i32, i32, i32
  }
  func.func @transform_1(%arg0: i32) -> (i32, i32, i32) {
    %c0_i32 = arith.constant 0 : i32
    %c0_i32_0 = arith.constant 0 : i32
    %c0_i32_1 = arith.constant 0 : i32
    return %arg0, %c0_i32, %c0_i32_0 : i32, i32, i32
  }
  func.func @transform_2(%arg0: i32) -> (i32, i32, i32) {
    %c0_i32 = arith.constant 0 : i32
    %c0_i32_0 = arith.constant 0 : i32
    %c0_i32_1 = arith.constant 0 : i32
    return %arg0, %c0_i32, %c0_i32_0 : i32, i32, i32
  }
  func.func @transform_3(%arg0: i32) -> (i32, i32) {
    %c0_i32 = arith.constant 0 : i32
    %c0_i32_0 = arith.constant 0 : i32
    %c0_i32_1 = arith.constant 0 : i32
    return %c0_i32, %c0_i32_0 : i32, i32
  }
  func.func @transform_4(%arg0: i32) -> (i32, i32) {
    %c0_i32 = arith.constant 0 : i32
    %c0_i32_0 = arith.constant 0 : i32
    %c0_i32_1 = arith.constant 0 : i32
    return %c0_i32, %c0_i32_0 : i32, i32
  }
  func.func @transform_5(%arg0: i32) -> (i32, i32) {
    %c0_i32 = arith.constant 0 : i32
    %c0_i32_0 = arith.constant 0 : i32
    %c0_i32_1 = arith.constant 0 : i32
    return %c0_i32, %c0_i32_0 : i32, i32
  }
  func.func @transform_6(%arg0: i32) -> (i32, i32) {
    %c0_i32 = arith.constant 0 : i32
    %c0_i32_0 = arith.constant 0 : i32
    %c0_i32_1 = arith.constant 0 : i32
    return %c0_i32, %c0_i32_0 : i32, i32
  }
  func.func @transform_7(%arg0: i32) -> (i32, i32) {
    %c0_i32 = arith.constant 0 : i32
    %c0_i32_0 = arith.constant 0 : i32
    %c0_i32_1 = arith.constant 0 : i32
    return %c0_i32, %c0_i32_0 : i32, i32
  }
  func.func @transform_8(%arg0: i32) -> (i32, i32, i32) {
    %c0_i32 = arith.constant 0 : i32
    %c0_i32_0 = arith.constant 0 : i32
    %c0_i32_1 = arith.constant 0 : i32
    return %arg0, %c0_i32, %c0_i32_0 : i32, i32, i32
  }
  func.func @transform_9(%arg0: i32) -> (i32, i32, i32) {
    %c0_i32 = arith.constant 0 : i32
    %c0_i32_0 = arith.constant 0 : i32
    %c0_i32_1 = arith.constant 0 : i32
    return %arg0, %c0_i32, %c0_i32_0 : i32, i32, i32
  }
  func.func @transform_10(%arg0: i32) -> (i32, i32, i32) {
    %c0_i32 = arith.constant 0 : i32
    %c0_i32_0 = arith.constant 0 : i32
    %c0_i32_1 = arith.constant 0 : i32
    return %arg0, %c0_i32, %c0_i32_0 : i32, i32, i32
  }
}

</mosaic_0001>

<bundles_post_ra>
// kernel: tpu_custom_call.1
= control target key start
LH: loop header
LB: loop body
LE: loop exit
PB: predicated region body
PF: predicated region fallthrough
CT: control target
= control target key end

     0   :  { %16 = vsyncpa [#allocation4], 0  ;;  %s1406_s0 = inlined_call_operand.vmem [shape: bf16[2,18,4], index: 0, kind: input, shape index: {}]   ;;  %s1407_s1 = inlined_call_operand.vmem [shape: bf16[2,18,32], index: 1, kind: input, shape index: {}]   ;;  %s1408_s2 = inlined_call_operand.hbm [shape: f32[2,16,32], index: 2, kind: input, shape index: {}]   ;;  %s1409_s3 = inlined_call_operand.vmem [shape: bf16[108,128], index: 3, kind: input, shape index: {}]   ;;  %s1410_s4 = inlined_call_operand.hbm [shape: f32[1,128], index: 4, kind: input, shape index: {}]   ;;  %s1411_s5 = inlined_call_operand.vmem [shape: f32[16,32], index: 5, kind: input, shape index: {}]   ;;  %s1412_s6 = inlined_call_operand.vmem [shape: f32[16,32], index: 6, kind: input, shape index: {}]   ;;  %s1413_s7 = inlined_call_operand.hbm [shape: f32[16,32], index: 7, kind: input, shape index: {}]   ;;  %s1414_s8 = inlined_call_operand.hbm [shape: bf16[2,16,32], index: 8, kind: output, shape index: {0}]   ;;  %s1415_s9 = inlined_call_operand.hbm [shape: f32[2,16,32], index: 9, kind: output, shape index: {1}]   ;;  %s1416_s10 = inlined_call_operand.hbm [shape: f32[2,8,32], index: 10, kind: output, shape index: {2}]  }
   0x1   :  { %17 = vsyncpa [#allocation7], 0 }
   0x2   :  { %18 = vsyncpa [#allocation5], 0 }
   0x3   :  { %19 = vsyncpa [#allocation11], 0  ;;  %s1031_s13 = smov [#allocation6]   ;;  %s1032_s15 = smov [#allocation3]  }
   0x4   :  { %s44_s14 = sshll.u32 %s1031_s13, 4  ;;  %s29_s16 = sshll.u32 %s1032_s15, 4  ;;  %s45_s14 = int_to_ptr.vmem [resolvable:$true] %s44_s14  ;;  %s1100_s16 = int_to_ptr.vmem [resolvable:$true] %s29_s16 }
   0x5   :  { %s891_s19 = scalar_lea.hbm %s1410_s4, 16 }
   0x6   :  { %p892_p0 = scmp.ne.s32.totalorder %s1410_s4, %s891_s19  ;;  %p895_p1 = scmp.lt.u32.totalorder %s891_s19, %s1410_s4 }
   0x8   :  { %p897_p2 = pnand %p895_p1, %p892_p0 }
   0xa   :  { %900 = shalt.err (!%p897_p2)
}
   0xb   :  { %s901_s24 = scalar_lea.vmem %s45_s14, 16  ;;  %s905_s25 = scalar_lea.vmem %s45_s14, 32 }
   0xc   :  { %p902_p3 = scmp.ne.s32.totalorder %s45_s14, %s901_s24  ;;  %p906_p4 = scmp.lt.s32.totalorder %s45_s14, %s45_s14 }
   0xd   :  { %p907_p5 = scmp.lt.s32.totalorder %s905_s25, %s901_s24 }
   0xf   :  { %p908_p6 = por %p907_p5, %p906_p4 }
  0x11   :  { %p909_p7 = pnand %p908_p6, %p902_p3 }
  0x13   :  { %912 = shalt.err (!%p909_p7)
}
  0x14   :  { %47 = dma.hbm_to_vmem [thread:$0]  %s1410_s4, 16, %s45_s14, [#allocation7]  }
  0x15   :  { %s913_s30 = scalar_lea.hbm %s1408_s2, 512 }
  0x16   :  { %p914_p8 = scmp.ne.s32.totalorder %s1408_s2, %s913_s30  ;;  %p917_p9 = scmp.lt.u32.totalorder %s913_s30, %s1408_s2 }
  0x18   :  { %p919_p10 = pnand %p917_p9, %p914_p8 }
  0x1a   :  { %922 = shalt.err (!%p919_p10)
}
  0x1b   :  { %s923_s17 = scalar_lea.vmem %s1100_s16, 512  ;;  %p928_p12 = scmp.lt.s32.totalorder %s1100_s16, %s1100_s16 }
  0x1c   :  { %p924_p11 = scmp.ne.s32.totalorder %s1100_s16, %s923_s17  ;;  %p929_p13 = scmp.lt.s32.totalorder %s923_s17, %s923_s17 }
  0x1e   :  { %p930_p0 = por %p929_p13, %p928_p12 }
  0x20   :  { %p931_p1 = pnand %p930_p0, %p924_p11 }
  0x22   :  { %934 = shalt.err (!%p931_p1)
}
  0x23   :  { %s1033_s4 = smov 128   ;;  %s1034_s14 = smov 8  }
  0x24   :  { %35 = dma.hbm_to_vmem [thread:$0]  %s1408_s2, 512, %s1100_s16, [#allocation4], %s1033_s4, %s1033_s4, %s1034_s14  }
  0x25   :  { %s1035_s20 = smov [#allocation8]   ;;  %s935_s24 = scalar_lea.hbm %s1413_s7, 256 }
  0x26   :  { %s57_s21 = sshll.u32 %s1035_s20, 4  ;;  %p936_p2 = scmp.ne.s32.totalorder %s1413_s7, %s935_s24  ;;  %s58_s21 = int_to_ptr.vmem [resolvable:$true] %s57_s21 }
  0x27   :  { %p939_p3 = scmp.lt.u32.totalorder %s935_s24, %s1413_s7 }
  0x29   :  { %p941_p4 = pnand %p939_p3, %p936_p2 }
  0x2b   :  { %944 = shalt.err (!%p941_p4)
}
  0x2c   :  { %s945_s29 = scalar_lea.vmem %s58_s21, 256  ;;  %p950_p6 = scmp.lt.s32.totalorder %s58_s21, %s58_s21 }
  0x2d   :  { %p946_p5 = scmp.ne.s32.totalorder %s58_s21, %s945_s29  ;;  %p951_p7 = scmp.lt.s32.totalorder %s945_s29, %s945_s29 }
  0x2f   :  { %p952_p8 = por %p951_p7, %p950_p6 }
  0x31   :  { %p953_p9 = pnand %p952_p8, %p946_p5 }
  0x33   :  { %956 = shalt.err (!%p953_p9)
}
  0x34   :  { %63 = dma.hbm_to_vmem [thread:$0]  %s1413_s7, 256, %s58_s21, [#allocation7], %s1033_s4, %s1033_s4, %s1034_s14  }
  0x35   :  { %1023 = dma.done.wait [#allocation4], 512  }
  0x36   :  { %1024 = vsyncadd [#allocation4], 4294966784 }
  0x37   :  { %1025 = dma.done.wait [#allocation7], 272  }
  0x38   :  { %1026 = vsyncadd [#allocation7], 4294967024  ;;  %v84_v0 = vld [vmem:[%s1406_s0 + $0xc] sm:$0xf]  ;;  %v1155_v1 = vld [vmem:[%s1406_s0 + $0x10] sm:$0xf] }
  0x39   :  { %vm141_vm0 = vcmask 1046528   ;;  %v731_v2 = vcombine.low %v84_v0, %v1155_v1  ;;  %v82_v3 = vld [vmem:[%s1406_s0] sm:$0xf]  ;;  %v1164_v4 = vld [vmem:[%s1406_s0 + $0x4] sm:$0xf]  ;;  %s1036_s25 = smov 96  }
  0x3a   :  { %vm106_vm1 = vsmask.f32 7424  ;;  %v1167_v5 = vcombine.low %v82_v3, %v1164_v4  ;;  %v75_v6 = vld [vmem:[%s1407_s1 + $0x4] sm:$0xf]  ;;  %v80_v7 = vld [vmem:[%s1407_s1] sm:$0xe] }
  0x3b   :  { %v89_v8 = vld [vmem:[%s1406_s0 + $0xc] sm:$0xe]  ;;  %164 = vrot.lane.b32.xlu1 %v731_v2, %s1036_s25  ;;  %v187_v9 = vshll.u32 %v731_v2, 16  ;;  %v812_v10 = vld [vmem:[%s1407_s1 + $0x8] ss:$0 sps:$4 sm:$0x11]   ;;  %v728_v11 = vcombine.low %v80_v7, %v75_v6 }
  0x3c   :  { %v74_v12 = vld [vmem:[%s1407_s1] sm:$0xf]  ;;  %162 = vrot.lane.b32.xlu0 %v1167_v5, %s1036_s25  ;;  %v175_v13 = vshll.u32 %v1167_v5, 16  ;;  %v76_v15 = vld [vmem:[%s1407_s1 + $0xc] sm:$0xf]  ;;  %v185_v17 = vshrl.u32 %v731_v2, 16  ;;  %v735_v32 = vcombine.low %v89_v8, %v1155_v1 }
  0x3d   :  { %v1188_v14 = vcombine.low %v74_v12, %v75_v6  ;;  %v77_v16 = vld [vmem:[%s1407_s1 + $0x10] sm:$0xf]  ;;  %v142_v18 = vrot.slane %v728_v11, 1  ;;  %v143_v19 = vrot.slane %v812_v10, 1  ;;  %v115_v20 = vshll.u32 %v812_v10, 16  ;;  %v820_v22 = vld [vmem:[%s1409_s3] sm:$0xff]  }
  0x3e   :  { %v1196_v21 = vcombine.low %v76_v15, %v77_v16  ;;  %v81_v25 = vld [vmem:[%s1407_s1 + $0xc] sm:$0xe]  ;;  %v816_v28 = vld [vmem:[%s1407_s1 + $0x14] ss:$0 sps:$4 sm:$0x11]   ;;  %775 = vmatprep.subr.bf16.mxu0 %v820_v22  ;;  %s1037_s23 = smov 64  }
  0x3f   :  { %v108_v23 = vshrl.u32 %v1188_v14, 16  ;;  %v110_v24 = vshll.u32 %v1188_v14, 16  ;;  %v144_v26 = vsel %vm141_vm0, %v142_v18, %v143_v19  ;;  %v117_v27 = vrot.slane %v115_v20, 1  ;;  %v821_v31 = vld [vmem:[%s1409_s3 + $0x8] sm:$0xff]   ;;  %v88_v33 = vld [vmem:[%s1406_s0] sm:$0xe]  ;;  %776 = vmatpush3.bf16.msra.mxu0 %v820_v22 }
  0x40   :  { %v729_v29 = vcombine.low %v81_v25, %v77_v16  ;;  %v120_v30 = vshrl.u32 %v1196_v21, 16  ;;  %148 = vrot.lane.b32.xlu1 %v144_v26, %s1037_s23  ;;  %v122_v35 = vshll.u32 %v1196_v21, 16  ;;  %v818_v36 = vld [vmem:[%s1406_s0 + $0x14] ss:$0 sps:$4 sm:$0x11]   ;;  %v189_v37 = vrot.slane %v187_v9, 1  ;;  %777 = vmatprep.subr.bf16.mxu0 %v821_v31 }
  0x41   :  { %v112_v34 = vrot.slane %v110_v24, 1  ;;  %v146_v39 = vrot.slane %v816_v28, 1  ;;  %v127_v40 = vshll.u32 %v816_v28, 16  ;;  %v173_v41 = vshrl.u32 %v1167_v5, 16  ;;  %v822_v47 = vld [vmem:[%s1409_s3 + $0x10] sm:$0xff]   ;;  %s1038_s2 = smov 32  }
  0x42   :  { %v145_v38 = vrot.slane %v729_v29, 1  ;;  %v124_v43 = vrot.slane %v122_v35, 1  ;;  %v190_v44 = vor.u32 %v189_v37, %v185_v17  ;;  %v192_v45 = vshll.u32 %v818_v36, 16  ;;  %v819_v46 = vld [vmem:[%s1406_s0 + $0x8] ss:$0 sps:$4 sm:$0x11]  }
  0x43   :  { %v113_v42 = vor.u32 %v112_v34, %v108_v23  ;;  %v129_v49 = vrot.slane %v127_v40, 1  ;;  %v177_v50 = vrot.slane %v175_v13, 1  ;;  %v180_v54 = vshll.u32 %v819_v46, 16  ;;  %778 = vmatpush3.bf16.msra.mxu0 %v821_v31  ;;  %v823_v58 = vld [vmem:[%s1409_s3 + $0x18] sm:$0xff]   ;;  %s1039_s30 = smov 100   ;;  %v824_v0 = vld [vmem:[%s1409_s3 + $0x20] sm:$0xff]  }
  0x44   :  { %v147_v48 = vsel %vm141_vm0, %v145_v38, %v146_v39  ;;  %v125_v52 = vor.u32 %v124_v43, %v120_v30  ;;  %v194_v53 = vrot.slane %v192_v45, 1  ;;  %v734_v55 = vcombine.low %v88_v33, %v1164_v4  ;;  %779 = vmatprep.subr.bf16.mxu0 %v822_v47  ;;  %s1040_s13 = smov 104   ;;  %v825_v4 = vld [vmem:[%s1409_s3 + $0x28] sm:$0xff]   ;;  %v826_v6 = vld [vmem:[%s1409_s3 + $0x30] sm:$0x3f]   ;;  %v399_v39 = vld [vmem:[%s1412_s6] sm:$0xff] }
  0x45   :  { %v118_v51 = vsel %vm106_vm1, %v113_v42, %v117_v27  ;;  %150 = vrot.lane.b32.xlu1 %v147_v48, %s1037_s23  ;;  %v209_v56 = vrot.slane %v735_v32, 1  ;;  %v210_v57 = vrot.slane %v818_v36, 1  ;;  %v178_v61 = vor.u32 %v177_v50, %v173_v41  ;;  %v361_v41 = vld [vmem:[#allocation3] sm:$0xff]  ;;  %v362_v45 = vld [vmem:[#allocation3 + $0x8] sm:$0xff]  ;;  %s1042_s26 = smov [#allocation12]  }
  0x46   :  { %131 = vrot.lane.b32.xlu0 %v118_v51, %s1038_s2  ;;  %v130_v59 = vsel %vm106_vm1, %v125_v52, %v129_v49  ;;  %v195_v60 = vsel %vm106_vm1, %v190_v44, %v194_v53  ;;  %v182_v62 = vrot.slane %v180_v54, 1  ;;  %v206_v2 = vrot.slane %v734_v55, 1  ;;  %v400_v42 = vld [vmem:[%s1412_s6 + $0x8] sm:$0xff]  ;;  %v364_v49 = vld [vmem:[#allocation3 + $0x18] sm:$0xff]  ;;  %s704_s27 = sshll.u32 %s1042_s26, 4  ;;  %s705_s27 = int_to_ptr.vmem [resolvable:$true] %s704_s27 }
  0x47   :  { %780 = vmatpush3.bf16.msra.mxu0 %v822_v47  ;;  %v211_v63 = vsel %vm141_vm0, %v209_v56, %v210_v57  ;;  %v207_v3 = vrot.slane %v819_v46, 1  ;;  %vm308_vm2 = vcmask 1045504   ;;  %vm216_vm3 = vcmask 261120   ;;  %v363_v47 = vld [vmem:[#allocation3 + $0x10] sm:$0xff]  ;;  %v365_v51 = vld [vmem:[%s1411_s5] sm:$0xff]  ;;  %v366_v52 = vld [vmem:[%s1411_s5 + $0x8] sm:$0xff] }
  0x48   :  { %781 = vmatprep.subr.bf16.mxu0 %v823_v58  ;;  %v183_v1 = vsel %vm106_vm1, %v178_v61, %v182_v62  ;;  %v310_v7 = vsel %vm308_vm2, %v826_v6, 0  ;;  %vm221_vm4 = vcmask 523264   ;;  %vm226_vm5 = vcmask 785408   ;;  %s1041_s5 = smov [#allocation10]  }
  0x49   :  { %198 = vrot.lane.b32.xlu1 %v195_v60, %s1039_s30  ;;  %v208_v5 = vsel %vm141_vm0, %v206_v2, %v207_v3  ;;  %vm231_vm6 = vcmask 818176   ;;  %vm236_vm7 = vcmask 850944   ;;  %vm303_vm8 = vcmask 883712  }
  0x4a   :  { %133 = vrot.lane.b32.xlu0 %v130_v59, %s1038_s2  ;;  %v401_v43 = vmul.f32 %v399_v39, %v361_v41  ;;  %v402_v46 = vmul.f32 %v400_v42, %v362_v45  ;;  %v403_v48 = vmul.f32 %v399_v39, %v363_v47  ;;  %v404_v50 = vmul.f32 %v400_v42, %v364_v49 }
  0x4b   :  { %782 = vmatpush3.bf16.msra.mxu0 %v823_v58  ;;  %v369_v53 = vmul.f32 %v365_v51, %v363_v47  ;;  %v370_v54 = vmul.f32 %v366_v52, %v364_v49  ;;  %v367_v55 = vmul.f32 %v365_v51, %v361_v41  ;;  %v368_v57 = vmul.f32 %v366_v52, %v362_v45 }
  0x4c   :  { %783 = vmatprep.subr.bf16.mxu0 %v824_v0  ;;  %vm639_vm9 = vcmask 257024  }
  0x4d   :  { %214 = vrot.lane.b32.xlu1 %v211_v63, %s1040_s13 }
  0x4e   :  { %196 = vrot.lane.b32.xlu0 %v183_v1, %s1039_s30 }
  0x4f   :  { %784 = vmatpush3.bf16.msra.mxu0 %v824_v0 }
  0x50   :  { %785 = vmatprep.subr.bf16.mxu0 %v825_v4 }
  0x52   :  { %212 = vrot.lane.b32.xlu0 %v208_v5, %s1040_s13 }
  0x53   :  { %786 = vmatpush3.bf16.msra.mxu0 %v825_v4 }
  0x54   :  { %793 = vmatprep.subr.msk.bf16.mxu0 %vm308_vm2, %v826_v6 }
  0x57   :  { %788 = vmatpush3.bf16.msra.mxu0 %v310_v7 }
  0xad   :  { %v165_v8 = vpop.permute.xlu1 %164 }
  0xae   :  { %v163_v9 = vpop.permute.xlu0 %162 }
  0xb2   :  { %v149_v10 = vpop.permute.xlu1 %148 }
  0xb7   :  { %v151_v11 = vpop.permute.xlu1 %150 }
  0xb8   :  { %v132_v12 = vpop.permute.xlu0 %131 }
  0xb9   :  { %v218_v15 = vsel %vm216_vm3, %v1188_v14, %v132_v12  ;;  %v736_v14 = vld [vmem:[#allocation6] ss:$0 sm:$0xff] }
  0xba   :  { %v223_v19 = vsel %vm221_vm4, %v218_v15, %v149_v10 }
  0xbb   :  { %v199_v17 = vpop.permute.xlu1 %198  ;;  %v228_v24 = vsel %vm226_vm5, %v223_v19, %v163_v9 }
  0xbc   :  { %v134_v13 = vpop.permute.xlu0 %133 }
  0xbd   :  { %v220_v16 = vsel %vm216_vm3, %v1196_v21, %v134_v13 }
  0xbe   :  { %v225_v18 = vsel %vm221_vm4, %v220_v16, %v151_v11 }
  0xbf   :  { %v230_v20 = vsel %vm226_vm5, %v225_v18, %v165_v8  ;;  %v215_v25 = vpop.permute.xlu1 %214 }
  0xc0   :  { %v197_v22 = vpop.permute.xlu0 %196  ;;  %v235_v23 = vsel %vm231_vm6, %v230_v20, %v199_v17 }
  0xc1   :  { %v233_v26 = vsel %vm231_vm6, %v228_v24, %v197_v22  ;;  %v240_v29 = vsel %vm236_vm7, %v235_v23, %v215_v25  ;;  %v513_v23 = vld [vmem:[#allocation8] sm:$0xff]  ;;  %v514_v24 = vld [vmem:[#allocation8 + $0x8] sm:$0xff] }
  0xc4   :  { %v213_v27 = vpop.permute.xlu0 %212 }
  0xc5   :  { %v238_v28 = vsel %vm236_vm7, %v233_v26, %v213_v27 }
  0xc6   :  { %789 = vmatprep.mubr.msk.bf16.mxu0 %vm303_vm8, %v238_v28 }
  0xc7   :  { %790 = vmatmul.mubr.msk.bf16.vlgmr.msra.gmra.mrb[0].mxu0 %vm303_vm8, %v240_v29 }
 0x19a   :  { %v791_v21 = vpop.f32.mrb[0].mxu0 }
 0x19b   :  { %v346_v30 = vpop.f32.mrb[1].mxu0  ;;  %v1259_v34 = vadd.f32 %v791_v21, %v736_v14 }
 0x19c   :  { %v1257_v31 = vadd.f32 %v736_v14, %v346_v30  ;;  %v792_v32 = vpop.f32.mrb[2].mxu0 }
 0x19d   :  { %v349_v33 = vpop.f32.mrb[3].mxu0  ;;  %v1264_v36 = vadd.f32 %v792_v32, %v736_v14  ;;  %v373_v56 = vadd.f32 %v369_v53, %v1259_v34 }
 0x19e   :  { %827 = vtanh.f32 %v1257_v31  ;;  %v1262_v35 = vadd.f32 %v736_v14, %v349_v33  ;;  %v371_v59 = vadd.f32 %v367_v55, %v1257_v31 }
 0x19f   :  { %v374_v58 = vadd.f32 %v370_v54, %v1264_v36  ;;  %v748_v60 = vmul.f32 -1.442695, %v373_v56 }
 0x1a0   :  { %829 = vtanh.f32 %v1262_v35  ;;  %v372_v61 = vadd.f32 %v368_v57, %v1262_v35  ;;  %v746_v63 = vmul.f32 -1.442695, %v371_v59 }
 0x1a1   :  { %831 = vtanh.f32 %v1259_v34  ;;  %v749_v62 = vmul.f32 -1.442695, %v374_v58 }
 0x1a2   :  { %833 = vtanh.f32 %v1264_v36  ;;  %v747_v0 = vmul.f32 -1.442695, %v372_v61 }
 0x1a3   :  { %835 = vpow2.f32 %v748_v60 }
 0x1a4   :  { %837 = vpow2.f32 %v749_v62 }
 0x1a5   :  { %839 = vpow2.f32 %v746_v63 }
 0x1a6   :  { %841 = vpow2.f32 %v747_v0 }
 0x1a8   :  { %v828_v37 = vpop.eup %827 }
 0x1a9   :  { %477 = vrot.lane.b32.xlu0 %v828_v37, %s1037_s23 }
 0x1aa   :  { %v830_v38 = vpop.eup %829 }
 0x1ab   :  { %479 = vrot.lane.b32.xlu1 %v830_v38, %s1037_s23  ;;  %v832_v40 = vpop.eup %831 }
 0x1ac   :  { %v834_v44 = vpop.eup %833 }
 0x1ad   :  { %481 = vrot.lane.b32.xlu0 %v832_v40, %s1037_s23  ;;  %v836_v1 = vpop.eup %835 }
 0x1ae   :  { %v838_v2 = vpop.eup %837  ;;  %v389_v3 = vadd.f32 1.0, %v836_v1 }
 0x1af   :  { %483 = vrot.lane.b32.xlu1 %v834_v44, %s1037_s23  ;;  %v840_v4 = vpop.eup %839  ;;  %v390_v5 = vadd.f32 1.0, %v838_v2 }
 0x1b0   :  { %v842_v6 = vpop.eup %841  ;;  %v387_v7 = vadd.f32 1.0, %v840_v4  ;;  %843 = vrcp.f32 %v389_v3 }
 0x1b1   :  { %409 = vrot.lane.b32.xlu0 %v401_v43, %s1038_s2  ;;  %v388_v8 = vadd.f32 1.0, %v842_v6  ;;  %845 = vrcp.f32 %v390_v5 }
 0x1b2   :  { %847 = vrcp.f32 %v387_v7 }
 0x1b3   :  { %411 = vrot.lane.b32.xlu1 %v402_v46, %s1038_s2  ;;  %849 = vrcp.f32 %v388_v8 }
 0x1b5   :  { %413 = vrot.lane.b32.xlu0 %v403_v48, %s1038_s2 }
 0x1b7   :  { %415 = vrot.lane.b32.xlu1 %v404_v50, %s1038_s2 }
 0x1b9   :  { %453 = vrot.lane.b32.xlu0 %v361_v41, %s1038_s2 }
 0x1ba   :  { %v844_v11 = vpop.eup %843 }
 0x1bb   :  { %455 = vrot.lane.b32.xlu1 %v362_v45, %s1038_s2  ;;  %v846_v15 = vpop.eup %845 }
 0x1bc   :  { %v848_v18 = vpop.eup %847 }
 0x1bd   :  { %457 = vrot.lane.b32.xlu0 %v363_v47, %s1038_s2  ;;  %v850_v20 = vpop.eup %849 }
 0x1bf   :  { %459 = vrot.lane.b32.xlu1 %v364_v49, %s1038_s2 }
 0x21b   :  { %v478_v9 = vpop.permute.xlu0 %477 }
 0x21c   :  { %v489_v19 = vmul.f32 %v848_v18, %v478_v9 }
 0x21d   :  { %v480_v10 = vpop.permute.xlu1 %479 }
 0x21e   :  { %v490_v22 = vmul.f32 %v850_v20, %v480_v10 }
 0x21f   :  { %v482_v12 = vpop.permute.xlu0 %481 }
 0x220   :  { %v491_v13 = vmul.f32 %v844_v11, %v482_v12 }
 0x221   :  { %v484_v16 = vpop.permute.xlu1 %483 }
 0x222   :  { %v492_v17 = vmul.f32 %v846_v15, %v484_v16  ;;  %501 = vrot.lane.b32.xlu0 %v491_v13, %s1038_s2 }
 0x223   :  { %v410_v25 = vpop.permute.xlu0 %409 }
 0x224   :  { %503 = vrot.lane.b32.xlu1 %v492_v17, %s1038_s2  ;;  %v421_v27 = vadd.f32 %v410_v25, %v1257_v31 }
 0x225   :  { %v412_v26 = vpop.permute.xlu1 %411 }
 0x226   :  { %497 = vrot.lane.b32.xlu0 %v489_v19, %s1038_s2  ;;  %v422_v29 = vadd.f32 %v412_v26, %v1262_v35  ;;  %v750_v30 = vmul.f32 -1.442695, %v421_v27 }
 0x227   :  { %v414_v28 = vpop.permute.xlu0 %413 }
 0x228   :  { %499 = vrot.lane.b32.xlu1 %v490_v22, %s1038_s2  ;;  %v423_v21 = vadd.f32 %v414_v28, %v1259_v34  ;;  %v751_v33 = vmul.f32 -1.442695, %v422_v29  ;;  %851 = vpow2.f32 %v750_v30 }
 0x229   :  { %v416_v14 = vpop.permute.xlu1 %415 }
 0x22a   :  { %517 = vrot.lane.b32.xlu0 %v513_v23, %s1038_s2  ;;  %v424_v32 = vadd.f32 %v416_v14, %v1264_v36  ;;  %v752_v37 = vmul.f32 -1.442695, %v423_v21  ;;  %853 = vpow2.f32 %v751_v33 }
 0x22b   :  { %v454_v46 = vpop.permute.xlu0 %453 }
 0x22c   :  { %519 = vrot.lane.b32.xlu1 %v514_v24, %s1038_s2  ;;  %v753_v38 = vmul.f32 -1.442695, %v424_v32  ;;  %855 = vpow2.f32 %v752_v37 }
 0x22d   :  { %v456_v48 = vpop.permute.xlu1 %455 }
 0x22e   :  { %857 = vpow2.f32 %v753_v38 }
 0x22f   :  { %v458_v49 = vpop.permute.xlu0 %457 }
 0x231   :  { %v460_v50 = vpop.permute.xlu1 %459 }
 0x232   :  { %v852_v39 = vpop.eup %851 }
 0x233   :  { %v437_v42 = vadd.f32 1.0, %v852_v39 }
 0x234   :  { %v854_v40 = vpop.eup %853 }
 0x235   :  { %v438_v44 = vadd.f32 1.0, %v854_v40  ;;  %859 = vrcp.f32 %v437_v42 }
 0x236   :  { %v856_v41 = vpop.eup %855 }
 0x237   :  { %v439_v45 = vadd.f32 1.0, %v856_v41  ;;  %861 = vrcp.f32 %v438_v44 }
 0x238   :  { %v858_v43 = vpop.eup %857 }
 0x239   :  { %v440_v47 = vadd.f32 1.0, %v858_v43  ;;  %863 = vrcp.f32 %v439_v45 }
 0x23b   :  { %865 = vrcp.f32 %v440_v47 }
 0x23f   :  { %v860_v51 = vpop.eup %859 }
 0x240   :  { %v465_v56 = vmul.f32 %v860_v51, %v454_v46 }
 0x241   :  { %v862_v53 = vpop.eup %861 }
 0x242   :  { %v466_v59 = vmul.f32 %v862_v53, %v456_v48 }
 0x243   :  { %v864_v55 = vpop.eup %863 }
 0x244   :  { %v467_v61 = vmul.f32 %v864_v55, %v458_v49 }
 0x245   :  { %v866_v58 = vpop.eup %865 }
 0x246   :  { %v468_v0 = vmul.f32 %v866_v58, %v460_v50 }
 0x294   :  { %v502_v52 = vpop.permute.xlu0 %501 }
 0x295   :  { %v1307_v1 = vadd.f32 %v502_v52, %v467_v61 }
 0x296   :  { %v504_v54 = vpop.permute.xlu1 %503 }
 0x297   :  { %v1309_v4 = vadd.f32 %v504_v54, %v468_v0 }
 0x298   :  { %v498_v57 = vpop.permute.xlu0 %497 }
 0x299   :  { %v509_v60 = vadd.f32 %v498_v57, %v465_v56 }
 0x29a   :  { %v500_v62 = vpop.permute.xlu1 %499 }
 0x29b   :  { %867 = vtanh.f32 %v509_v60  ;;  %v510_v63 = vadd.f32 %v500_v62, %v466_v59 }
 0x29c   :  { %v518_v2 = vpop.permute.xlu0 %517 }
 0x29d   :  { %869 = vtanh.f32 %v510_v63  ;;  %v523_v3 = vmul.f32 %v518_v2, %v509_v60  ;;  %v525_v7 = vmul.f32 %v518_v2, %v1307_v1 }
 0x29e   :  { %v520_v5 = vpop.permute.xlu1 %519  ;;  %871 = vtanh.f32 %v1307_v1 }
 0x29f   :  { %v524_v6 = vmul.f32 %v520_v5, %v510_v63  ;;  %531 = vrot.lane.b32.xlu0 %v523_v3, %s1037_s23  ;;  %873 = vtanh.f32 %v1309_v4  ;;  %v526_v8 = vmul.f32 %v520_v5, %v1309_v4 }
 0x2a1   :  { %533 = vrot.lane.b32.xlu1 %v524_v6, %s1037_s23 }
 0x2a3   :  { %535 = vrot.lane.b32.xlu0 %v525_v7, %s1037_s23 }
 0x2a5   :  { %v868_v9 = vpop.eup %867  ;;  %537 = vrot.lane.b32.xlu1 %v526_v8, %s1037_s23 }
 0x2a7   :  { %v870_v10 = vpop.eup %869  ;;  %579 = vrot.lane.b32.xlu0 %v868_v9, %s1037_s23 }
 0x2a8   :  { %v872_v11 = vpop.eup %871 }
 0x2a9   :  { %581 = vrot.lane.b32.xlu1 %v870_v10, %s1037_s23  ;;  %v874_v12 = vpop.eup %873 }
 0x2ab   :  { %583 = vrot.lane.b32.xlu0 %v872_v11, %s1037_s23 }
 0x2ad   :  { %585 = vrot.lane.b32.xlu1 %v874_v12, %s1037_s23 }
 0x2af   :  { %599 = vrot.lane.b32.xlu0 %v509_v60, %s1036_s25 }
 0x2b1   :  { %601 = vrot.lane.b32.xlu1 %v510_v63, %s1036_s25 }
 0x311   :  { %v532_v13 = vpop.permute.xlu0 %531 }
 0x312   :  { %v543_v15 = vadd.f32 %v532_v13, %v1257_v31 }
 0x313   :  { %v534_v16 = vpop.permute.xlu1 %533 }
 0x314   :  { %v754_v17 = vmul.f32 -1.442695, %v543_v15  ;;  %v544_v18 = vadd.f32 %v534_v16, %v1262_v35 }
 0x315   :  { %v536_v19 = vpop.permute.xlu0 %535 }
 0x316   :  { %v755_v20 = vmul.f32 -1.442695, %v544_v18  ;;  %v545_v22 = vadd.f32 %v536_v19, %v1259_v34  ;;  %875 = vpow2.f32 %v754_v17 }
 0x317   :  { %v538_v23 = vpop.permute.xlu1 %537 }
 0x318   :  { %v756_v24 = vmul.f32 -1.442695, %v545_v22  ;;  %v546_v25 = vadd.f32 %v538_v23, %v1264_v36  ;;  %877 = vpow2.f32 %v755_v20 }
 0x319   :  { %v580_v26 = vpop.permute.xlu0 %579 }
 0x31a   :  { %879 = vpow2.f32 %v756_v24  ;;  %v757_v27 = vmul.f32 -1.442695, %v546_v25 }
 0x31b   :  { %v582_v28 = vpop.permute.xlu1 %581 }
 0x31c   :  { %881 = vpow2.f32 %v757_v27 }
 0x31d   :  { %v584_v31 = vpop.permute.xlu0 %583 }
 0x31f   :  { %v586_v29 = vpop.permute.xlu1 %585 }
 0x320   :  { %v876_v14 = vpop.eup %875 }
 0x321   :  { %v600_v21 = vpop.permute.xlu0 %599  ;;  %v559_v32 = vadd.f32 1.0, %v876_v14 }
 0x322   :  { %611 = vst.msk [vmem:[#allocation10] sm:$0xff] %vm216_vm3, %v600_v21  ;;  %v878_v35 = vpop.eup %877 }
 0x323   :  { %v602_v30 = vpop.permute.xlu1 %601  ;;  %v560_v37 = vadd.f32 1.0, %v878_v35 }
 0x324   :  { %v880_v34 = vpop.eup %879  ;;  %612 = vst.msk [vmem:[#allocation10 + $0x8] sm:$0xff] %vm216_vm3, %v602_v30 }
 0x325   :  { %v561_v33 = vadd.f32 1.0, %v880_v34 }
 0x326   :  { %v882_v36 = vpop.eup %881 }
 0x327   :  { %883 = vrcp.f32 %v561_v33  ;;  %v562_v38 = vadd.f32 1.0, %v882_v36 }
 0x328   :  { %885 = vrcp.f32 %v559_v32 }
 0x329   :  { %887 = vrcp.f32 %v562_v38 }
 0x32a   :  { %889 = vrcp.f32 %v560_v37 }
 0x331   :  { %v884_v39 = vpop.eup %883 }
 0x332   :  { %v886_v40 = vpop.eup %885  ;;  %v593_v41 = vmul.f32 %v884_v39, %v584_v31 }
 0x333   :  { %v888_v42 = vpop.eup %887  ;;  %v591_v45 = vmul.f32 %v886_v40, %v580_v26 }
 0x334   :  { %v594_v43 = vmul.f32 %v888_v42, %v586_v29  ;;  %652 = vrot.lane.b32.xlu0 %v593_v41, %s1038_s2  ;;  %v890_v44 = vpop.eup %889  ;;  %v764_v49 = vpack.c.bf16 %v593_v41, %v593_v41 }
 0x335   :  { %v592_v46 = vmul.f32 %v890_v44, %v582_v28  ;;  %v762_v47 = vpack.c.bf16 %v591_v45, %v591_v45 }
 0x336   :  { %654 = vrot.lane.b32.xlu1 %v594_v43, %s1038_s2  ;;  %v765_v50 = vpack.c.bf16 %v594_v43, %v594_v43 }
 0x337   :  { %v763_v48 = vpack.c.bf16 %v592_v46, %v592_v46 }
 0x338   :  { %648 = vrot.lane.b32.xlu0 %v591_v45, %s1038_s2 }
 0x33a   :  { %650 = vrot.lane.b32.xlu1 %v592_v46, %s1038_s2 }
 0x33c   :  { %603 = vrot.lane.b32.xlu0 %v1307_v1, %s1036_s25 }
 0x33e   :  { %605 = vrot.lane.b32.xlu1 %v1309_v4, %s1036_s25  ;;  %s692_s25 = sshll.u32 %s1041_s5, 4  ;;  %s693_s25 = int_to_ptr.vmem [resolvable:$true] %s692_s25 }
 0x33f   :  { %s957_s28 = scalar_lea.vmem %s693_s25, 512  ;;  %p962_p11 = scmp.lt.s32.totalorder %s693_s25, %s693_s25 }
 0x340   :  { %627 = vrot.lane.b32.xlu0 %v762_v47, %s1038_s2  ;;  %p958_p10 = scmp.ne.s32.totalorder %s693_s25, %s957_s28  ;;  %p963_p12 = scmp.lt.s32.totalorder %s957_s28, %s957_s28 }
 0x342   :  { %629 = vrot.lane.b32.xlu1 %v763_v48, %s1038_s2  ;;  %p964_p13 = por %p963_p12, %p962_p11 }
 0x344   :  { %631 = vrot.lane.b32.xlu0 %v764_v49, %s1038_s2  ;;  %p965_p0 = pnand %p964_p13, %p958_p10 }
 0x346   :  { %633 = vrot.lane.b32.xlu1 %v765_v50, %s1038_s2 }
 0x3a6   :  { %v653_v51 = vpop.permute.xlu0 %652 }
 0x3a7   :  { %662 = vst.msk [vmem:[#allocation2 + $0x10] sm:$0xff] %vm216_vm3, %v653_v51 }
 0x3a8   :  { %v655_v52 = vpop.permute.xlu1 %654 }
 0x3a9   :  { %663 = vst.msk [vmem:[#allocation2 + $0x18] sm:$0xff] %vm216_vm3, %v655_v52 }
 0x3aa   :  { %v649_v53 = vpop.permute.xlu0 %648 }
 0x3ab   :  { %660 = vst.msk [vmem:[#allocation2] sm:$0xff] %vm216_vm3, %v649_v53 }
 0x3ac   :  { %v651_v54 = vpop.permute.xlu1 %650 }
 0x3ad   :  { %661 = vst.msk [vmem:[#allocation2 + $0x8] sm:$0xff] %vm216_vm3, %v651_v54 }
 0x3ae   :  { %v604_v55 = vpop.permute.xlu0 %603 }
 0x3af   :  { %613 = vst.msk [vmem:[#allocation10 + $0x10] sm:$0xff] %vm216_vm3, %v604_v55 }
 0x3b0   :  { %v606_v56 = vpop.permute.xlu1 %605  ;;  %v666_v57 = vld [vmem:[#allocation2 + $0x10] ss:$2 sm:$0xff]  ;;  %v670_v58 = vld [vmem:[#allocation2 + $0x11] ss:$2 sm:$0xff] }
 0x3b1   :  { %614 = vst.msk [vmem:[#allocation10 + $0x18] sm:$0xff] %vm216_vm3, %v606_v56  ;;  %v672_v59 = vmax.f32 %v666_v57, %v670_v58 }
 0x3b2   :  { %v628_v60 = vpop.permute.xlu0 %627 }
 0x3b3   :  { %968 = shalt.err (!%p965_p0)
}
 0x3b4   :  { %s969_s0 = scalar_lea.hbm %s1415_s9, 512 }
 0x3b5   :  { %p970_p1 = scmp.ne.s32.totalorder %s1415_s9, %s969_s0  ;;  %p973_p2 = scmp.lt.u32.totalorder %s969_s0, %s1415_s9 }
 0x3b7   :  { %p975_p3 = pnand %p973_p2, %p970_p1 }
 0x3b9   :  { %978 = shalt.err (!%p975_p3)
}
 0x3ba   :  { %698 = dma.vmem_to_hbm [thread:$0]  %s693_s25, 512, %s1415_s9, [#allocation11], %s1033_s4, %s1033_s4, %s1034_s14   ;;  %640 = vst.msk [vmem:[#allocation9] sm:$0xf] %vm639_vm9, %v628_v60  ;;  %v630_v61 = vpop.permute.xlu1 %629  ;;  %v664_v62 = vld [vmem:[#allocation2] ss:$2 sm:$0xff]  ;;  %v632_v1 = vpop.permute.xlu0 %631 }
 0x3bb   :  { %674 = vst.msk [vmem:[#allocation12 + $0x8] sm:$0xff] %vm216_vm3, %v672_v59  ;;  %s1043_s17 = smov [#allocation9]   ;;  %v668_v63 = vld [vmem:[#allocation2 + $0x1] ss:$2 sm:$0xff]  ;;  %s979_s9 = scalar_lea.vmem %s705_s27, 256 }
 0x3bc   :  { %s680_s7 = sshll.u32 %s1043_s17, 4  ;;  %641 = vst.msk [vmem:[#allocation9 + $0x4] sm:$0xf] %vm639_vm9, %v630_v61  ;;  %v671_v0 = vmax.f32 %v664_v62, %v668_v63  ;;  %642 = vst.msk [vmem:[#allocation9 + $0x8] sm:$0xf] %vm639_vm9, %v632_v1  ;;  %p980_p4 = scmp.ne.s32.totalorder %s705_s27, %s979_s9  ;;  %s1368_s7 = int_to_ptr.vmem [resolvable:$true] %s680_s7 }
 0x3bd   :  { %p984_p5 = scmp.lt.s32.totalorder %s705_s27, %s705_s27  ;;  %p985_p6 = scmp.lt.s32.totalorder %s979_s9, %s979_s9 }
 0x3be   :  { %673 = vst.msk [vmem:[#allocation12] sm:$0xff] %vm216_vm3, %v671_v0  ;;  %v634_v2 = vpop.permute.xlu1 %633 }
 0x3bf   :  { %p986_p7 = por %p985_p6, %p984_p5 }
 0x3c1   :  { %p987_p8 = pnand %p986_p7, %p980_p4 }
 0x3c3   :  { %990 = shalt.err (!%p987_p8)
}
 0x3c4   :  { %s991_s19 = scalar_lea.hbm %s1416_s10, 256 }
 0x3c5   :  { %p992_p9 = scmp.ne.s32.totalorder %s1416_s10, %s991_s19  ;;  %p995_p10 = scmp.lt.u32.totalorder %s991_s19, %s1416_s10 }
 0x3c7   :  { %p997_p11 = pnand %p995_p10, %p992_p9 }
 0x3c9   :  { %1000 = shalt.err (!%p997_p11)
}
 0x3ca   :  { %710 = dma.vmem_to_hbm [thread:$0]  %s705_s27, 256, %s1416_s10, [#allocation11], %s1033_s4, %s1033_s4, %s1034_s14   ;;  %643 = vst.msk [vmem:[#allocation9 + $0xc] sm:$0xf] %vm639_vm9, %v634_v2 }
 0x3cb   :  { %s1001_s5 = scalar_lea.vmem %s1368_s7, 256  ;;  %p1006_p13 = scmp.lt.s32.totalorder %s1368_s7, %s1368_s7 }
 0x3cc   :  { %p1002_p12 = scmp.ne.s32.totalorder %s1368_s7, %s1001_s5  ;;  %p1007_p0 = scmp.lt.s32.totalorder %s1001_s5, %s1001_s5 }
 0x3ce   :  { %p1008_p1 = por %p1007_p0, %p1006_p13 }
 0x3d0   :  { %p1009_p2 = pnand %p1008_p1, %p1002_p12 }
 0x3d2   :  { %1012 = shalt.err (!%p1009_p2)
}
 0x3d3   :  { %s1013_s28 = scalar_lea.hbm %s1414_s8, 256 }
 0x3d4   :  { %p1014_p3 = scmp.ne.s32.totalorder %s1414_s8, %s1013_s28  ;;  %p1017_p4 = scmp.lt.u32.totalorder %s1013_s28, %s1414_s8 }
 0x3d6   :  { %p1019_p5 = pnand %p1017_p4, %p1014_p3 }
 0x3d8   :  { %1022 = shalt.err (!%p1019_p5)
}
 0x3d9   :  { %s1044_s4 = smov 4  }
 0x3da   :  { %686 = dma.vmem_to_hbm [thread:$0]  %s1368_s7, 256, %s1414_s8, [#allocation5], %s1037_s23, %s1037_s23, %s1044_s4  }
 0x3db   :  { %1027 = dma.done.wait [#allocation5], 256  }
 0x3dc   :  { %1028 = vsyncadd [#allocation5], 4294967040 }
 0x3dd   :  { %1029 = dma.done.wait [#allocation11], 768  }
 0x3de   :  { %1030 = vsyncadd [#allocation11], 4294966528 }
 0x3df   :  { %720 = vsyncpa [#allocation4], 1 }
 0x3e0   :  { %721 = vsyncpa [#allocation7], 1 }
 0x3e1   :  { %722 = vsyncpa [#allocation5], 1 }
 0x3e2   :  { %723 = vsyncpa [#allocation11], 1 }

</bundles_post_ra>
